<compile_context>
chip_gen: v6e
topology: v6e:2x2x1
jax: 0.10.0
libtpu: 0.0.40
codegen_flags: <defaults>
</compile_context>

<pallas_src>
import functools

import jax
import jax.numpy as jnp
from jax.experimental import pallas as pl
from jax.experimental.pallas import tpu as pltpu

_LANE = 128      # TPU lane width (last dim of a vreg)
_SUBLANE = 8     # TPU sublane width (second-to-last dim of a vreg)


# ---------------------------------------------------------------------------
# small helpers
# ---------------------------------------------------------------------------
def _round_up(n: int, m: int) -> int:
    return ((n + m - 1) // m) * m


def _pad2(a, rows: int, cols: int):
    """Zero-pad a 2-D array up to (rows, cols)."""
    return jnp.pad(a, ((0, rows - a.shape[0]), (0, cols - a.shape[1])))


@functools.lru_cache(maxsize=None)
def _roll_matches_jnp() -> bool:
    """One-time cached probe: does pltpu.roll move data toward HIGHER lane
    indices (jnp.roll convention)?  Makes the XLU-roll re-stack robust across
    jax versions; costs a single tiny kernel launch, only when order > 1."""
    def k(x_ref, o_ref):
        o_ref[...] = pltpu.roll(x_ref[...], shift=1, axis=1)
    x = jnp.tile(jnp.arange(_LANE, dtype=jnp.float32)[None, :], (_SUBLANE, 1))
    y = pl.pallas_call(
        k, out_shape=jax.ShapeDtypeStruct((_SUBLANE, _LANE), jnp.float32))(x)
    return bool(y[0, 1] == 0.0)   # jnp convention: value 0 lands at lane 1


# ---------------------------------------------------------------------------
# in-kernel dynamics (shared by both kernels) — pure VMEM math
# ---------------------------------------------------------------------------
def _vf_block(t, x_block, wx_ref, wt_ref, b1_ref, w2_ref, b2_ref, *,
              compute_dtype):
    """vf(t, x) = tanh(x @ Wx + (t*wt + b1)) @ W2 + b2 for one batch tile.

    Matmul operands in `compute_dtype` (bf16 -> v6e/v7x MXU fast path);
    accumulation and the bias/tanh epilogue stay f32 (keeps VPU/EUP work f32
    on v5e, which has no bf16 elementwise path)."""
    xc = x_block.astype(compute_dtype)
    h = jnp.dot(xc, wx_ref[...], preferred_element_type=jnp.float32)
    bias = t * wt_ref[...] + b1_ref[...]          # (1, hp): one row, not (tb, hp)
    h = jnp.tanh(h + bias)                        # EUP tanh, single broadcast add
    return jnp.dot(h.astype(compute_dtype), w2_ref[...],
                   preferred_element_type=jnp.float32) + b2_ref[...]


def _restack_higher_order(x_state, dxdt, *, order, d_state, roll_jnp):
    """Fused torchdyn higher_order_forward:
         out[:, :D-s] = x[:, s:D]; out[:, D-s:D] = dxdt[:, :s]; out[:, D:] = 0
    implemented with XLU lane rotations + a lane mask (no masked slice /
    concatenate on the VALU / vector-store path)."""
    s_o = d_state // order
    tb, dp = x_state.shape
    x_f32 = x_state.astype(jnp.float32)
    d_f32 = dxdt
    dp_out = d_f32.shape[1]
    if dp_out < dp:      # widen at a lane-aligned (multiple-of-128) boundary
        d_f32 = jnp.concatenate(
            [d_f32, jnp.zeros((tb, dp - dp_out), jnp.float32)], axis=-1)
    elif dp_out > dp:
        d_f32 = d_f32[:, :dp]

    # desired: x_shift[:, j]         = x[:, j + s_o]     for j < D - s_o
    #          d_shift[:, D-s_o + i] = dxdt[:, i]        for i < s_o
    if roll_jnp:   # pltpu.roll(x, k)[..., j] == x[..., (j - k) % dp]
        shift_x = (dp - s_o) % dp
        shift_d = (d_state - s_o) % dp
    else:          # opposite rotation direction
        shift_x = s_o % dp
        shift_d = (dp - (d_state - s_o)) % dp
    x_shift = pltpu.roll(x_f32, shift=shift_x, axis=1)
    d_shift = pltpu.roll(d_f32, shift=shift_d, axis=1)
    lane = jax.lax.broadcasted_iota(jnp.int32, (tb, dp), 1)
    return jnp.where(lane < d_state - s_o, x_shift,
                     jnp.where(lane < d_state, d_shift, 0.0))


# ---------------------------------------------------------------------------
# kernel 1: a single DEFunc.forward evaluation (one NFE)
# ---------------------------------------------------------------------------
def _defunc_fwd_kernel(t_ref, x_ref, wx_ref, wt_ref, b1_ref, w2_ref, b2_ref,
                       o_ref, *, order, d_state, compute_dtype, roll_jnp):
    # t lives in SMEM: DEFunc item (1) — the kernel reads the depth variable
    # directly instead of torchdyn's per-submodule `module.t = t` assignment.
    x_blk = x_ref[...]                            # streamed in compute_dtype
    dxdt = _vf_block(t_ref[0], x_blk, wx_ref, wt_ref, b1_ref, w2_ref, b2_ref,
                     compute_dtype=compute_dtype)
    if order == 1:
        o_ref[...] = dxdt.astype(o_ref.dtype)
    else:
        out = _restack_higher_order(x_blk, dxdt, order=order,
                                    d_state=d_state, roll_jnp=roll_jnp)
        o_ref[...] = out.astype(o_ref.dtype)


# ---------------------------------------------------------------------------
# kernel 2: fused fixed-step Euler loop — ALL NFEs inside ONE kernel body
# ---------------------------------------------------------------------------
def _euler_kernel(ts_ref, dts_ref, x_ref, wx_ref, wt_ref, b1_ref, w2_ref,
                  b2_ref, o_ref, *, num_steps, order, d_state, compute_dtype,
                  roll_jnp, unroll):
    """grid = (batch_tiles,).  The whole step loop runs in-kernel: state is an
    f32 loop carry, per-step t / dt come from SMEM, weights stay VMEM resident
    (constant index_maps), output is written once at the end.  No per-step
    grid overhead and no step-axis pipelining (nothing to pipeline: everything
    is already resident)."""
    state = x_ref[...].astype(jnp.float32)

    def step(i, s):
        dxdt = _vf_block(ts_ref[i], s, wx_ref, wt_ref, b1_ref, w2_ref, b2_ref,
                         compute_dtype=compute_dtype)
        if order == 1:
            dstate = dxdt
        else:
            dstate = _restack_higher_order(s, dxdt, order=order,
                                           d_state=d_state, roll_jnp=roll_jnp)
        return s + dts_ref[i] * dstate

    if unroll is True or (isinstance(unroll, int) and not isinstance(unroll, bool)
                          and unroll >= num_steps):
        # full trace-time unroll: one long basic block for the LLO scheduler
        for i in range(num_steps):
            state = step(i, state)
    else:
        chunk = int(unroll) if unroll else 1
        state = jax.lax.fori_loop(0, num_steps, step, state, unroll=chunk)

    o_ref[...] = state.astype(o_ref.dtype)


# ---------------------------------------------------------------------------
# Pallas-backed vector field
# ---------------------------------------------------------------------------
class MLPVectorField:
    """Time-conditioned MLP vector field with a Pallas TPU forward.

    Weights are zero-padded once at construction so every lane dim is a
    multiple of 128; matmul operands are stored in `compute_dtype`
    (bf16 by default), biases/epilogue in f32."""

    def __init__(self, key, d_in, hidden, d_out, compute_dtype=jnp.bfloat16):
        self.d_in, self.hidden, self.d_out = int(d_in), int(hidden), int(d_out)
        self.compute_dtype = jnp.dtype(compute_dtype)
        self.stream_dtype = (self.compute_dtype
                             if self.compute_dtype == jnp.dtype(jnp.bfloat16)
                             else jnp.dtype(jnp.float32))
        self.dp_in = _round_up(self.d_in, _LANE)
        self.hp = _round_up(self.hidden, _LANE)
        self.dp_out = _round_up(self.d_out, _LANE)

        k1, k2, k3 = jax.random.split(key, 3)
        scale1 = 1.0 / jnp.sqrt(jnp.float32(self.d_in + 1))
        wx = jax.random.normal(k1, (self.d_in, self.hidden), jnp.float32) * scale1
        wt = jax.random.normal(k2, (1, self.hidden), jnp.float32) * scale1
        b1 = jnp.zeros((1, self.hidden), jnp.float32)
        w2 = jax.random.normal(k3, (self.hidden, self.d_out), jnp.float32) \
            / jnp.sqrt(jnp.float32(self.hidden))
        b2 = jnp.zeros((1, self.d_out), jnp.float32)
        self.raw = (wx, wt, b1, w2, b2)          # unpadded f32 (reference use)

        # pad lane dims ONCE; matmul operands in compute_dtype, biases f32.
        self.padded = (
            _pad2(wx, self.dp_in, self.hp).astype(self.compute_dtype),   # Wx
            _pad2(wt, 1, self.hp),                                       # wt (f32)
            _pad2(b1, 1, self.hp),                                       # b1 (f32)
            _pad2(w2, self.hp, self.dp_out).astype(self.compute_dtype),  # W2
            _pad2(b2, 1, self.dp_out),                                   # b2 (f32)
        )
        self.weight_bytes = sum(int(a.size) * a.dtype.itemsize for a in self.padded)

    def __call__(self, t, x, order: int = 1, block_b: int = 256):
        return self.forward(t, x, order=order, block_b=block_b)

    def forward(self, t, x, order: int = 1, block_b: int = 256):
        B, D = x.shape
        assert D == self.d_in
        if order > 1:
            assert self.d_out * order == D, \
                "higher-order dynamics require vf: (B, D) -> (B, D // order)"
            dp_out_fwd, d_out_real = self.dp_in, D          # full-state output
        else:
            dp_out_fwd, d_out_real = self.dp_out, self.d_out

        stream_dtype = self.stream_dtype
        # bf16 vregs pack (16,128): use 16-row granularity when streaming bf16.
        pack = 2 * _SUBLANE if stream_dtype == jnp.dtype(jnp.bfloat16) else _SUBLANE
        tb = min(_round_up(B, pack), _round_up(block_b, pack))
        Bp = _round_up(B, tb)

        # skip the full-array HBM pad round trip when already tile aligned
        if B == Bp and D == self.dp_in and x.dtype == stream_dtype:
            xp = x
        else:
            xp = jnp.zeros((Bp, self.dp_in), stream_dtype)
            xp = xp.at[:B, :D].set(x.astype(stream_dtype))
        t_arr = jnp.asarray(t, jnp.float32).reshape((1,))

        roll_jnp = _roll_matches_jnp() if order > 1 else True
        kernel = functools.partial(
            _defunc_fwd_kernel, order=order, d_state=D,
            compute_dtype=self.compute_dtype, roll_jnp=roll_jnp)
        smem = pl.BlockSpec(memory_space=pltpu.MemorySpace.SMEM)

        tile_bytes = tb * (self.dp_in * stream_dtype.itemsize
                           + dp_out_fwd * x.dtype.itemsize)
        vmem_limit = int(min(max(2 * self.weight_bytes + 4 * tile_bytes + (4 << 20),
                                 32 << 20), 100 << 20))
        flops = 2 * Bp * (self.dp_in * self.hp + self.hp * self.dp_out)
        bytes_accessed = int(Bp * self.dp_in * stream_dtype.itemsize
                             + Bp * dp_out_fwd * x.dtype.itemsize
                             + self.weight_bytes)

        out = pl.pallas_call(
            kernel,
            out_shape=jax.ShapeDtypeStruct((Bp, dp_out_fwd), x.dtype),
            grid_spec=pltpu.PrefetchScalarGridSpec(
                num_scalar_prefetch=0,
                grid=(Bp // tb,),
                in_specs=[
                    smem,                                                    # t
                    pl.BlockSpec((tb, self.dp_in), lambda b: (b, 0)),        # x
                    pl.BlockSpec((self.dp_in, self.hp), lambda b: (0, 0)),   # Wx
                    pl.BlockSpec((1, self.hp), lambda b: (0, 0)),            # wt
                    pl.BlockSpec((1, self.hp), lambda b: (0, 0)),            # b1
                    pl.BlockSpec((self.hp, self.dp_out), lambda b: (0, 0)),  # W2
                    pl.BlockSpec((1, self.dp_out), lambda b: (0, 0)),        # b2
                ],
                out_specs=pl.BlockSpec((tb, dp_out_fwd), lambda b: (b, 0)),
            ),
            compiler_params=pltpu.CompilerParams(
                dimension_semantics=("parallel",),       # batch tiles -> both TCs on v7x
                vmem_limit_bytes=vmem_limit),
            cost_estimate=pl.CostEstimate(
                flops=int(flops), transcendentals=int(Bp * self.hp),
                bytes_accessed=bytes_accessed),
        )(t_arr, xp, *self.padded)
        return out[:B, :d_out_real]


# ---------------------------------------------------------------------------
# DEFunc wrapper (mirrors torchdyn.core.DEFunc.forward)
# ---------------------------------------------------------------------------
class DEFunc:
    def __init__(self, vector_field, order: int = 1):
        self.vf, self.nfe = vector_field, 0.0
        self.order, self.integral_loss, self.sensitivity = order, None, None

    def __call__(self, t, x):
        return self.forward(t, x)

    def forward(self, t, x):
        self.nfe += 1   # NOTE: python-side counter; not traced under jax.jit
        # (1) time/"depth" broadcast: the kernel reads `t` from SMEM directly,
        #     playing the role of torchdyn's `module.t = t` assignment loop.
        if self.integral_loss is not None and self.sensitivity == "autograd":
            # TODO(synk): integral-loss augmentation needs a user-supplied loss
            # callable; stock DEFunc ships with integral_loss=None, so this
            # branch is inert and left unimplemented.
            raise NotImplementedError
        if self.order > 1:
            return self.higher_order_forward(t, x)
        return self.vf(t, x)

    def higher_order_forward(self, t, x):
        # The [x', x'', ..., vf(t, x)] re-stack is fused into the kernel's
        # output write (XLU roll + lane mask; no extra HBM round trip).
        return self.vf(t, x, order=self.order)


# ---------------------------------------------------------------------------
# fused solver loop: all NFEs of a fixed-step Euler integration in ONE kernel
# ---------------------------------------------------------------------------
def euler_integrate(defunc: DEFunc, x0, t_span, block_b: int = 256, unroll=None):
    vf, order = defunc.vf, defunc.order
    ts = jnp.asarray(t_span, jnp.float32)
    num_steps = int(ts.shape[0]) - 1
    assert num_steps >= 1
    t_starts, dts = ts[:-1], ts[1:] - ts[:-1]

    B, D = x0.shape
    assert D == vf.d_in
    if order == 1:
        assert vf.d_out == D
    else:
        assert vf.d_out * order == D

    tb = min(_round_up(B, _SUBLANE), _round_up(block_b, _SUBLANE))
    Bp = _round_up(B, tb)
    dp = vf.dp_in
    # state is carried in f32 for accumulation; x0 streamed once, so f32 is fine
    if B == Bp and D == dp and x0.dtype == jnp.float32:
        xp = x0
    else:
        xp = jnp.zeros((Bp, dp), jnp.float32).at[:B, :D].set(x0.astype(jnp.float32))

    if unroll is None:
        unroll = True if num_steps <= 32 else 8   # full unroll for short solves

    roll_jnp = _roll_matches_jnp() if order > 1 else True
    kernel = functools.partial(
        _euler_kernel, num_steps=num_steps, order=order, d_state=D,
        compute_dtype=vf.compute_dtype, roll_jnp=roll_jnp, unroll=unroll)
    smem = pl.BlockSpec(memory_space=pltpu.MemorySpace.SMEM)

    tile_bytes = 2 * tb * dp * 4
    vmem_limit = int(min(max(2 * vf.weight_bytes + 4 * tile_bytes + (4 << 20),
                             32 << 20), 100 << 20))
    flops = 2 * num_steps * Bp * (vf.dp_in * vf.hp + vf.hp * vf.dp_out)
    bytes_accessed = int(2 * Bp * dp * 4 + vf.weight_bytes)

    out = pl.pallas_call(
        kernel,
        out_shape=jax.ShapeDtypeStruct((Bp, dp), x0.dtype),
        grid_spec=pltpu.PrefetchScalarGridSpec(
            num_scalar_prefetch=0,
            grid=(Bp // tb,),                    # batch tiles only; steps in-kernel
            in_specs=[
                smem,                                                    # t  per step
                smem,                                                    # dt per step
                pl.BlockSpec((tb, dp), lambda b: (b, 0)),                # x0
                pl.BlockSpec((vf.dp_in, vf.hp), lambda b: (0, 0)),       # Wx (resident)
                pl.BlockSpec((1, vf.hp), lambda b: (0, 0)),              # wt
                pl.BlockSpec((1, vf.hp), lambda b: (0, 0)),              # b1
                pl.BlockSpec((vf.hp, vf.dp_out), lambda b: (0, 0)),      # W2 (resident)
                pl.BlockSpec((1, vf.dp_out), lambda b: (0, 0)),          # b2
            ],
            out_specs=pl.BlockSpec((tb, dp), lambda b: (b, 0)),
        ),
        compiler_params=pltpu.CompilerParams(
            dimension_semantics=("parallel",),
            vmem_limit_bytes=vmem_limit),
        cost_estimate=pl.CostEstimate(
            flops=int(flops), transcendentals=int(num_steps * Bp * vf.hp),
            bytes_accessed=bytes_accessed),
    )(t_starts, dts, xp, *vf.padded)

    defunc.nfe += float(num_steps)
    return out[:B, :D]


# ---------------------------------------------------------------------------
# pure-JAX references
# ---------------------------------------------------------------------------
def _vf_reference(t, x, raw, compute_dtype=jnp.float32):
    wx, wt, b1, w2, b2 = raw
    cd = jnp.dtype(compute_dtype)
    xc = x.astype(cd)
    h = jnp.tanh(jnp.dot(xc, wx.astype(cd), preferred_element_type=jnp.float32)
                 + (jnp.asarray(t, jnp.float32) * wt + b1))
    return jnp.dot(h.astype(cd), w2.astype(cd),
                   preferred_element_type=jnp.float32) + b2


def _defunc_reference(t, x, raw, order, compute_dtype=jnp.float32):
    dxdt = _vf_reference(t, x, raw, compute_dtype)
    if order == 1:
        return dxdt
    s = x.shape[1] // order
    pieces = [x[:, s * i: s * (i + 1)] for i in range(1, order)] + [dxdt]
    return jnp.concatenate(pieces, axis=1)


def _euler_reference(x0, t_span, raw, order, compute_dtype=jnp.float32):
    ts = jnp.asarray(t_span, jnp.float32)
    x = x0.astype(jnp.float32)
    for i in range(int(ts.shape[0]) - 1):
        dstate = _defunc_reference(ts[i], x, raw, order, compute_dtype)
        x = x + (ts[i + 1] - ts[i]) * dstate
    return x


# ---------------------------------------------------------------------------
# demo / correctness checks
# ---------------------------------------------------------------------------
if __name__ == "__main__":
    key = jax.random.PRNGKey(0)
    kx, kp1, kp2 = jax.random.split(key, 3)

    B, D, H = 8, 32, 64          # small: batch=8, state dim=32, hidden=64
    x = jax.random.normal(kx, (B, D), jnp.float32)
    t = jnp.float32(0.5)

    # (a) DEFunc.forward, order=1 — exact-semantics check (f32 MXU operands).
    vf_f32 = MLPVectorField(kp1, d_in=D, hidden=H, d_out=D,
                            compute_dtype=jnp.float32)
    defunc = DEFunc(vf_f32, order=1)
    dxdt = defunc(t, x)
    jax.block_until_ready(dxdt)
    ref = _defunc_reference(t, x, vf_f32.raw, order=1)
    assert dxdt.shape == x.shape and dxdt.dtype == x.dtype
    assert jnp.allclose(dxdt, ref, atol=1e-5, rtol=1e-5)

    # (b) DEFunc.forward, order=2 — higher-order re-stack fused in-kernel via
    #     XLU roll + lane mask (vf maps (B, D) -> (B, D // order)).
    vf_ho = MLPVectorField(kp2, d_in=D, hidden=H, d_out=D // 2,
                           compute_dtype=jnp.float32)
    defunc2 = DEFunc(vf_ho, order=2)
    out2 = defunc2(t, x)
    jax.block_until_ready(out2)
    ref2 = _defunc_reference(t, x, vf_ho.raw, order=2)
    assert out2.shape == x.shape
    assert jnp.allclose(out2, ref2, atol=1e-5, rtol=1e-5)

    # (c) Per-NFE forward with bf16 streamed x + bf16 MXU operands, f32 epilogue.
    vf_bf16 = MLPVectorField(kp1, d_in=D, hidden=H, d_out=D,
                             compute_dtype=jnp.bfloat16)
    defunc_fast = DEFunc(vf_bf16, order=1)
    dxdt_bf = defunc_fast(t, x)
    jax.block_until_ready(dxdt_bf)
    ref_bf = _defunc_reference(t, x, vf_bf16.raw, order=1,
                               compute_dtype=jnp.bfloat16)
    assert dxdt_bf.shape == x.shape
    assert jnp.allclose(dxdt_bf, ref_bf, atol=2e-2, rtol=2e-2)

    # (d) Fused solver loop: 16 explicit-Euler steps (16 NFEs) in ONE
    #     pallas_call with the step loop fully inside the kernel.
    t_span = jnp.linspace(0.0, 1.0, 17, dtype=jnp.float32)
    xT = euler_integrate(defunc_fast, x, t_span)
    jax.block_until_ready(xT)
    refT = _euler_reference(x, t_span, vf_bf16.raw, order=1,
                            compute_dtype=jnp.bfloat16)
    assert xT.shape == x.shape
    assert jnp.allclose(xT, refT, atol=2e-2, rtol=2e-2)

    print("KERNEL_OK")
</pallas_src>

<mosaic_0001>
module attributes {stable_mosaic.version = 11 : i64} {
  func.func @_defunc_fwd_kernel(%arg0: i32, %arg1: memref<1xf32, #tpu.memory_space<smem>>, %arg2: memref<8x128xf32, #tpu.memory_space<vmem>>, %arg3: memref<128x128xf32, #tpu.memory_space<vmem>>, %arg4: memref<1x128xf32, #tpu.memory_space<vmem>>, %arg5: memref<1x128xf32, #tpu.memory_space<vmem>>, %arg6: memref<128x128xf32, #tpu.memory_space<vmem>>, %arg7: memref<1x128xf32, #tpu.memory_space<vmem>>, %arg8: memref<8x128xf32, #tpu.memory_space<vmem>>) attributes {dimension_semantics = [#tpu.dimension_semantics<parallel>], iteration_bounds = array<i64: 1>, scalar_prefetch = 0 : i64, scratch_operands = 0 : i64, tpu.core_type = #tpu.core_type<tc>, window_params = [{transform_indices = @transform_0, window_bounds = array<i64: 1>}, {transform_indices = @transform_1, window_bounds = array<i64: 8, 128>}, {pipeline_mode = #tpu.pipeline_mode<synchronous>, transform_indices = @transform_2, window_bounds = array<i64: 128, 128>}, {pipeline_mode = #tpu.pipeline_mode<synchronous>, transform_indices = @transform_3, window_bounds = array<i64: 1, 128>}, {pipeline_mode = #tpu.pipeline_mode<synchronous>, transform_indices = @transform_4, window_bounds = array<i64: 1, 128>}, {pipeline_mode = #tpu.pipeline_mode<synchronous>, transform_indices = @transform_5, window_bounds = array<i64: 128, 128>}, {pipeline_mode = #tpu.pipeline_mode<synchronous>, transform_indices = @transform_6, window_bounds = array<i64: 1, 128>}, {transform_indices = @transform_7, window_bounds = array<i64: 8, 128>}]} {
    %c0 = arith.constant 0 : index
    %c0_0 = arith.constant 0 : index
    %0 = vector.load %arg2[%c0, %c0_0] : memref<8x128xf32, #tpu.memory_space<vmem>>, vector<8x128xf32>
    %c0_1 = arith.constant 0 : index
    %1 = memref.load %arg1[%c0_1] : memref<1xf32, #tpu.memory_space<smem>>
    %c0_2 = arith.constant 0 : index
    %c0_3 = arith.constant 0 : index
    %2 = vector.load %arg3[%c0_2, %c0_3] : memref<128x128xf32, #tpu.memory_space<vmem>>, vector<128x128xf32>
    %cst = arith.constant dense<0.000000e+00> : vector<8x128xf32>
    %3 = tpu.matmul %0, %2, %cst {dimension_numbers = #tpu.dot_dimension_numbers<[1], [0], [0], [1], [0, 0, 1, 1], [], []>} : vector<8x128xf32>, vector<128x128xf32>, vector<8x128xf32> -> vector<8x128xf32>
    %c0_4 = arith.constant 0 : index
    %c0_5 = arith.constant 0 : index
    %4 = vector.load %arg4[%c0_4, %c0_5] : memref<1x128xf32, #tpu.memory_space<vmem>>, vector<1x128xf32>
    %5 = vector.broadcast %1 : f32 to vector<1x128xf32>
    %6 = arith.mulf %5, %4 : vector<1x128xf32>
    %c0_6 = arith.constant 0 : index
    %c0_7 = arith.constant 0 : index
    %7 = vector.load %arg5[%c0_6, %c0_7] : memref<1x128xf32, #tpu.memory_space<vmem>>, vector<1x128xf32>
    %8 = arith.addf %6, %7 : vector<1x128xf32>
    %9 = vector.broadcast %8 : vector<1x128xf32> to vector<8x128xf32>
    %10 = arith.addf %3, %9 : vector<8x128xf32>
    %11 = math.tanh %10 : vector<8x128xf32>
    %c0_8 = arith.constant 0 : index
    %c0_9 = arith.constant 0 : index
    %12 = vector.load %arg6[%c0_8, %c0_9] : memref<128x128xf32, #tpu.memory_space<vmem>>, vector<128x128xf32>
    %cst_10 = arith.constant dense<0.000000e+00> : vector<8x128xf32>
    %13 = tpu.matmul %11, %12, %cst_10 {dimension_numbers = #tpu.dot_dimension_numbers<[1], [0], [0], [1], [0, 0, 1, 1], [], []>} : vector<8x128xf32>, vector<128x128xf32>, vector<8x128xf32> -> vector<8x128xf32>
    %c0_11 = arith.constant 0 : index
    %c0_12 = arith.constant 0 : index
    %14 = vector.load %arg7[%c0_11, %c0_12] : memref<1x128xf32, #tpu.memory_space<vmem>>, vector<1x128xf32>
    %15 = vector.broadcast %14 : vector<1x128xf32> to vector<8x128xf32>
    %16 = arith.addf %13, %15 : vector<8x128xf32>
    %c0_13 = arith.constant 0 : index
    %c0_14 = arith.constant 0 : index
    %17 = vector.load %arg8[%c0_13, %c0_14] : memref<8x128xf32, #tpu.memory_space<vmem>>, vector<8x128xf32>
    tpu.vector_store %arg8[%c0_13, %c0_14], %16 {strides = array<i32>} : memref<8x128xf32, #tpu.memory_space<vmem>>, vector<8x128xf32>,
    return
  }
  func.func @transform_0(%arg0: i32) -> i32 {
    %c0_i32 = arith.constant 0 : i32
    %c0_i32_0 = arith.constant 0 : i32
    return %c0_i32 : i32
  }
  func.func @transform_1(%arg0: i32) -> (i32, i32) {
    %c0_i32 = arith.constant 0 : i32
    %c0_i32_0 = arith.constant 0 : i32
    return %arg0, %c0_i32 : i32, i32
  }
  func.func @transform_2(%arg0: i32) -> (i32, i32) {
    %c0_i32 = arith.constant 0 : i32
    %c0_i32_0 = arith.constant 0 : i32
    %c0_i32_1 = arith.constant 0 : i32
    return %c0_i32, %c0_i32_0 : i32, i32
  }
  func.func @transform_3(%arg0: i32) -> (i32, i32) {
    %c0_i32 = arith.constant 0 : i32
    %c0_i32_0 = arith.constant 0 : i32
    %c0_i32_1 = arith.constant 0 : i32
    return %c0_i32, %c0_i32_0 : i32, i32
  }
  func.func @transform_4(%arg0: i32) -> (i32, i32) {
    %c0_i32 = arith.constant 0 : i32
    %c0_i32_0 = arith.constant 0 : i32
    %c0_i32_1 = arith.constant 0 : i32
    return %c0_i32, %c0_i32_0 : i32, i32
  }
  func.func @transform_5(%arg0: i32) -> (i32, i32) {
    %c0_i32 = arith.constant 0 : i32
    %c0_i32_0 = arith.constant 0 : i32
    %c0_i32_1 = arith.constant 0 : i32
    return %c0_i32, %c0_i32_0 : i32, i32
  }
  func.func @transform_6(%arg0: i32) -> (i32, i32) {
    %c0_i32 = arith.constant 0 : i32
    %c0_i32_0 = arith.constant 0 : i32
    %c0_i32_1 = arith.constant 0 : i32
    return %c0_i32, %c0_i32_0 : i32, i32
  }
  func.func @transform_7(%arg0: i32) -> (i32, i32) {
    %c0_i32 = arith.constant 0 : i32
    %c0_i32_0 = arith.constant 0 : i32
    return %arg0, %c0_i32 : i32, i32
  }
}

</mosaic_0001>

<bundles_post_ra>
// kernel: tpu_custom_call.1
= control target key start
LH: loop header
LB: loop body
LE: loop exit
PB: predicated region body
PF: predicated region fallthrough
CT: control target
= control target key end

     0   :  { %13 = vsyncpa [#allocation4], 0  ;;  %s584_s0 = inlined_call_operand.<no memory space> [shape: f32[1], index: 0, kind: input, shape index: {}]   ;;  %s585_s1 = inlined_call_operand.hbm [shape: f32[8,128], index: 1, kind: input, shape index: {}]   ;;  %s586_s2 = inlined_call_operand.hbm [shape: f32[128,128], index: 2, kind: input, shape index: {}]   ;;  %s587_s3 = inlined_call_operand.vmem [shape: f32[1,128], index: 3, kind: input, shape index: {}]   ;;  %s588_s4 = inlined_call_operand.vmem [shape: f32[1,128], index: 4, kind: input, shape index: {}]   ;;  %s589_s5 = inlined_call_operand.hbm [shape: f32[128,128], index: 5, kind: input, shape index: {}]   ;;  %s590_s6 = inlined_call_operand.vmem [shape: f32[1,128], index: 6, kind: input, shape index: {}]   ;;  %s591_s7 = inlined_call_operand.hbm [shape: f32[8,128], index: 7, kind: output, shape index: {}]  }
   0x1   :  { %14 = vsyncpa [#allocation7], 0 }
   0x2   :  { %15 = vsyncpa [#allocation5], 0  ;;  %s478_s24 = smov [#allocation6]  }
   0x3   :  { %s33_s25 = sshll.u32 %s478_s24, 4  ;;  %s34_s25 = int_to_ptr.vmem [resolvable:$true] %s33_s25 }
   0x4   :  { %s400_s26 = scalar_lea.vmem %s34_s25, 2048  ;;  %p405_p1 = scmp.lt.s32.totalorder %s34_s25, %s34_s25 }
   0x5   :  { %p401_p0 = scmp.ne.s32.totalorder %s34_s25, %s400_s26  ;;  %p406_p2 = scmp.lt.s32.totalorder %s400_s26, %s400_s26 }
   0x7   :  { %p407_p3 = por %p406_p2, %p405_p1 }
   0x9   :  { %p408_p4 = pnand %p407_p3, %p401_p0 }
   0xb   :  { %411 = shalt.err (!%p408_p4)
}
   0xc   :  { %s479_s27 = smov 128   ;;  %s480_s28 = smov 8  }
   0xd   :  { %39 = dma.hbm_to_vmem [thread:$0]  %s586_s2, 2048, %s34_s25, [#allocation7], %s479_s27, %s479_s27, %s480_s28  }
   0xe   :  { %s481_s8 = smov [#allocation3]   ;;  %s482_s10 = smov [#allocation8]  }
   0xf   :  { %s24_s9 = sshll.u32 %s481_s8, 4  ;;  %s49_s11 = sshll.u32 %s482_s10, 4  ;;  %s25_s9 = int_to_ptr.vmem [resolvable:$true] %s24_s9  ;;  %s50_s11 = int_to_ptr.vmem [resolvable:$true] %s49_s11 }
  0x10   :  { %s420_s12 = scalar_lea.vmem %s25_s9, 128  ;;  %p425_p6 = scmp.lt.s32.totalorder %s25_s9, %s25_s9 }
  0x11   :  { %p421_p5 = scmp.ne.s32.totalorder %s25_s9, %s420_s12  ;;  %p426_p7 = scmp.lt.s32.totalorder %s420_s12, %s420_s12 }
  0x13   :  { %p427_p8 = por %p426_p7, %p425_p6 }
  0x15   :  { %p428_p9 = pnand %p427_p8, %p421_p5 }
  0x17   :  { %431 = shalt.err (!%p428_p9)
}
  0x18   :  { %27 = dma.hbm_to_vmem [thread:$0]  %s585_s1, 128, %s25_s9, [#allocation4]  }
  0x19   :  { %s440_s15 = scalar_lea.vmem %s50_s11, 2048  ;;  %p445_p11 = scmp.lt.s32.totalorder %s50_s11, %s50_s11 }
  0x1a   :  { %p441_p10 = scmp.ne.s32.totalorder %s50_s11, %s440_s15  ;;  %p446_p12 = scmp.lt.s32.totalorder %s440_s15, %s440_s15 }
  0x1c   :  { %p447_p13 = por %p446_p12, %p445_p11 }
  0x1e   :  { %p448_p0 = pnand %p447_p13, %p441_p10 }
  0x20   :  { %451 = shalt.err (!%p448_p0)
}
  0x21   :  { %55 = dma.hbm_to_vmem [thread:$0]  %s589_s5, 2048, %s50_s11, [#allocation7], %s479_s27, %s479_s27, %s480_s28  }
  0x22   :  { %472 = dma.done.wait [#allocation4], 128  }
  0x23   :  { %473 = vsyncadd [#allocation4], 4294967168 }
  0x24   :  { %474 = dma.done.wait [#allocation7], 4096  }
  0x25   :  { %475 = vsyncadd [#allocation7], 4294963200  ;;  %v483_v0 = vmov 0.0   ;;  %vm484_vm0 = vmmov 0   ;;  %v84_v1 = vld [vmem:[#allocation6 + $0x78] sm:$0xff]  ;;  %v83_v2 = vld [vmem:[#allocation6 + $0x70] sm:$0xff]  ;;  %v91_v34 = vlaneseq  ;;  %v86_v36 = vstv %s584_s0 }
  0x26   :  { %312 = vmatprep.subr.mxu0 %v483_v0  ;;  %344 = vmatprep.mubr.msk.f32.mxu0 %vm484_vm0, %v483_v0  ;;  %v82_v3 = vld [vmem:[#allocation6 + $0x68] sm:$0xff]  ;;  %v81_v4 = vld [vmem:[#allocation6 + $0x60] sm:$0xff]  ;;  %v182_v5 = vld [vmem:[#allocation8 + $0x78] sm:$0xff]  ;;  %s485_s0 = smov [#allocation9]  }
  0x27   :  { %347 = vmatprep.subr.mxu1 %v483_v0  ;;  %379 = vmatprep.mubr.msk.f32.mxu1 %vm484_vm0, %v483_v0  ;;  %v80_v6 = vld [vmem:[#allocation6 + $0x58] sm:$0xff]  ;;  %v181_v7 = vld [vmem:[#allocation8 + $0x70] sm:$0xff]  ;;  %v180_v8 = vld [vmem:[#allocation8 + $0x68] sm:$0xff]  ;;  %v92_v38 = vshrl.u32 %v91_v34, 7  ;;  %s267_s22 = sshll.u32 %s485_s0, 4  ;;  %s268_s22 = int_to_ptr.vmem [resolvable:$true] %s267_s22 }
  0x28   :  { %313 = vmatpush3.msra.mxu0 %v84_v1  ;;  %348 = vmatpush3.msra.mxu1 %v182_v5  ;;  %v79_v9 = vld [vmem:[#allocation6 + $0x50] sm:$0xff]  ;;  %v179_v10 = vld [vmem:[#allocation8 + $0x60] sm:$0xff]  ;;  %v78_v11 = vld [vmem:[#allocation6 + $0x48] sm:$0xff]  ;;  %p457_p2 = scmp.lt.s32.totalorder %s268_s22, %s268_s22 }
  0x29   :  { %314 = vmatprep.subr.mxu0 %v483_v0  ;;  %349 = vmatprep.subr.mxu1 %v483_v0  ;;  %v178_v12 = vld [vmem:[#allocation8 + $0x58] sm:$0xff]  ;;  %v77_v13 = vld [vmem:[#allocation6 + $0x40] sm:$0xff]  ;;  %v177_v14 = vld [vmem:[#allocation8 + $0x50] sm:$0xff]  ;;  %v93_v41 = vsub.s32 0, %v92_v38 }
  0x2a   :  { %315 = vmatpush3.msra.mxu0 %v83_v2  ;;  %350 = vmatpush3.msra.mxu1 %v181_v7  ;;  %v76_v15 = vld [vmem:[#allocation6 + $0x38] sm:$0xff]  ;;  %v176_v16 = vld [vmem:[#allocation8 + $0x48] sm:$0xff]  ;;  %v75_v17 = vld [vmem:[#allocation6 + $0x30] sm:$0xff] }
  0x2b   :  { %316 = vmatprep.subr.mxu0 %v483_v0  ;;  %351 = vmatprep.subr.mxu1 %v483_v0  ;;  %v74_v18 = vld [vmem:[#allocation6 + $0x28] sm:$0xff]  ;;  %v73_v19 = vld [vmem:[#allocation6 + $0x20] sm:$0xff]  ;;  %v72_v20 = vld [vmem:[#allocation6 + $0x18] sm:$0xff] }
  0x2c   :  { %317 = vmatpush3.msra.mxu0 %v82_v3  ;;  %352 = vmatpush3.msra.mxu1 %v180_v8  ;;  %v71_v21 = vld [vmem:[#allocation6 + $0x10] sm:$0xff]  ;;  %v70_v22 = vld [vmem:[#allocation6 + $0x8] sm:$0xff]  ;;  %v69_v23 = vld [vmem:[#allocation6] sm:$0xff] }
  0x2d   :  { %318 = vmatprep.subr.mxu0 %v483_v0  ;;  %353 = vmatprep.subr.mxu1 %v483_v0  ;;  %v67_v24 = vld [vmem:[#allocation3] sm:$0xff]  ;;  %v175_v25 = vld [vmem:[#allocation8 + $0x40] sm:$0xff]  ;;  %v173_v27 = vld [vmem:[#allocation8 + $0x30] sm:$0xff] }
  0x2e   :  { %319 = vmatpush3.msra.mxu0 %v81_v4  ;;  %354 = vmatpush3.msra.mxu1 %v179_v10  ;;  %v174_v26 = vld [vmem:[#allocation8 + $0x38] sm:$0xff]  ;;  %v172_v28 = vld [vmem:[#allocation8 + $0x28] sm:$0xff]  ;;  %v171_v29 = vld [vmem:[#allocation8 + $0x20] sm:$0xff] }
  0x2f   :  { %320 = vmatprep.subr.mxu0 %v483_v0  ;;  %355 = vmatprep.subr.mxu1 %v483_v0  ;;  %v170_v30 = vld [vmem:[#allocation8 + $0x18] sm:$0xff]  ;;  %v169_v31 = vld [vmem:[#allocation8 + $0x10] sm:$0xff]  ;;  %v168_v32 = vld [vmem:[#allocation8 + $0x8] sm:$0xff] }
  0x30   :  { %321 = vmatpush3.msra.mxu0 %v80_v6  ;;  %356 = vmatpush3.msra.mxu1 %v178_v12  ;;  %v167_v33 = vld [vmem:[#allocation8] sm:$0xff]  ;;  %v85_v35 = vld [vmem:[%s587_s3] sm:$0x1] }
  0x31   :  { %322 = vmatprep.subr.mxu0 %v483_v0  ;;  %357 = vmatprep.subr.mxu1 %v483_v0  ;;  %v87_v37 = vmul.f32 %v86_v36, %v85_v35  ;;  %v88_v39 = vld [vmem:[%s588_s4] sm:$0x1]  ;;  %s452_s4 = scalar_lea.vmem %s268_s22, 128 }
  0x32   :  { %323 = vmatpush3.msra.mxu0 %v79_v9  ;;  %358 = vmatpush3.msra.mxu1 %v177_v14  ;;  %v277_v47 = vld [vmem:[%s590_s6] ss:$0 sm:$0xff]  ;;  %p453_p1 = scmp.ne.s32.totalorder %s268_s22, %s452_s4  ;;  %p458_p3 = scmp.lt.s32.totalorder %s452_s4, %s452_s4 }
  0x33   :  { %324 = vmatprep.subr.mxu0 %v483_v0  ;;  %359 = vmatprep.subr.mxu1 %v483_v0  ;;  %v89_v40 = vadd.f32 %v88_v39, %v87_v37 }
  0x34   :  { %325 = vmatpush3.msra.mxu0 %v78_v11  ;;  %360 = vmatpush3.msra.mxu1 %v176_v16  ;;  %p459_p4 = por %p458_p3, %p457_p2 }
  0x35   :  { %326 = vmatprep.subr.mxu0 %v483_v0  ;;  %361 = vmatprep.subr.mxu1 %v483_v0  ;;  %v94_v42 = vrot.slane %v89_v40, %v93_v41 }
  0x36   :  { %327 = vmatpush3.msra.mxu0 %v77_v13  ;;  %362 = vmatpush3.msra.mxu1 %v175_v25  ;;  %p460_p5 = pnand %p459_p4, %p453_p1 }
  0x37   :  { %328 = vmatprep.subr.mxu0 %v483_v0  ;;  %363 = vmatprep.subr.mxu1 %v483_v0 }
  0x38   :  { %329 = vmatpush3.msra.mxu0 %v76_v15  ;;  %364 = vmatpush3.msra.mxu1 %v174_v26 }
  0x39   :  { %330 = vmatprep.subr.mxu0 %v483_v0  ;;  %365 = vmatprep.subr.mxu1 %v483_v0 }
  0x3a   :  { %331 = vmatpush3.msra.mxu0 %v75_v17  ;;  %366 = vmatpush3.msra.mxu1 %v173_v27 }
  0x3b   :  { %332 = vmatprep.subr.mxu0 %v483_v0  ;;  %367 = vmatprep.subr.mxu1 %v483_v0 }
  0x3c   :  { %333 = vmatpush3.msra.mxu0 %v74_v18  ;;  %368 = vmatpush3.msra.mxu1 %v172_v28 }
  0x3d   :  { %334 = vmatprep.subr.mxu0 %v483_v0  ;;  %369 = vmatprep.subr.mxu1 %v483_v0 }
  0x3e   :  { %335 = vmatpush3.msra.mxu0 %v73_v19  ;;  %370 = vmatpush3.msra.mxu1 %v171_v29 }
  0x3f   :  { %336 = vmatprep.subr.mxu0 %v483_v0  ;;  %371 = vmatprep.subr.mxu1 %v483_v0 }
  0x40   :  { %337 = vmatpush3.msra.mxu0 %v72_v20  ;;  %372 = vmatpush3.msra.mxu1 %v170_v30 }
  0x41   :  { %338 = vmatprep.subr.mxu0 %v483_v0  ;;  %373 = vmatprep.subr.mxu1 %v483_v0 }
  0x42   :  { %339 = vmatpush3.msra.mxu0 %v71_v21  ;;  %374 = vmatpush3.msra.mxu1 %v169_v31 }
  0x43   :  { %340 = vmatprep.subr.mxu0 %v483_v0  ;;  %375 = vmatprep.subr.mxu1 %v483_v0 }
  0x44   :  { %341 = vmatpush3.msra.mxu0 %v70_v22  ;;  %376 = vmatpush3.msra.mxu1 %v168_v32 }
  0x45   :  { %342 = vmatprep.subr.mxu0 %v483_v0  ;;  %377 = vmatprep.subr.mxu1 %v483_v0 }
  0x46   :  { %343 = vmatpush3.msra.mxu0 %v69_v23  ;;  %378 = vmatpush3.msra.mxu1 %v167_v33 }
  0x47   :  { %345 = vmatmul.mubr.f32.vlgmr.msra.gmra.mxu0 %v67_v24 }
 0x107   :  { %v162_v43 = vpop.f32.mrf.mxu0 }
 0x108   :  { %v163_v44 = vadd.f32 %v162_v43, %v94_v42 }
 0x109   :  { %v346_v45 = vpop.f32.mrf.mxu0 }
 0x10a   :  { %390 = vtanh.f32 %v163_v44 }
 0x117   :  { %v391_v46 = vpop.eup %390 }
 0x118   :  { %380 = vmatmul.mubr.f32.vlgmr.msra.gmra.mxu1 %v391_v46 }
 0x1d8   :  { %v256_v48 = vpop.f32.mrf.mxu1 }
 0x1d9   :  { %v257_v49 = vadd.f32 %v277_v47, %v256_v48 }
 0x1da   :  { %v381_v50 = vpop.f32.mrf.mxu1 }
 0x1db   :  { %260 = vst [vmem:[#allocation9] sm:$0xff] %v257_v49 }
 0x1dc   :  { %463 = shalt.err (!%p460_p5)
}
 0x1dd   :  { %270 = dma.vmem_to_hbm [thread:$0]  %s268_s22, 128, %s591_s7, [#allocation5]  }
 0x1de   :  { %476 = dma.done.wait [#allocation5], 128  }
 0x1df   :  { %477 = vsyncadd [#allocation5], 4294967168 }
 0x1e0   :  { %274 = vsyncpa [#allocation4], 1 }
 0x1e1   :  { %275 = vsyncpa [#allocation7], 1 }
 0x1e2   :  { %276 = vsyncpa [#allocation5], 1 }

</bundles_post_ra>
